<compile_context>
chip_gen: v6e
topology: v6e:2x2x1
jax: 0.10.0
libtpu: 0.0.40
codegen_flags: <defaults>
</compile_context>

<pallas_src>
import math
from functools import partial

import jax
import jax.numpy as jnp
from jax.experimental import pallas as pl
from jax.experimental.pallas import tpu as pltpu


def _round_up(x, m):
    return ((x + m - 1) // m) * m


# --------------------------------------------------------------------------
# Pallas kernel 1: fused (pi_op + pi_op_goal) 3-layer MLP, transposed/lane-dense.
# Weights are block-diagonal combined + zero padded; dropout inactive (eval).
# --------------------------------------------------------------------------
def _pi_mlp_kernel(xT_ref, w1_ref, b1_ref, w2_ref, b2_ref, w3_ref, b3_ref, o_ref):
    xT = xT_ref[...]                                                     # (Dp, Tn) bf16
    h = jnp.dot(w1_ref[...], xT, preferred_element_type=jnp.float32)    # (H1, Tn) f32
    h = jnp.maximum(h + b1_ref[...], 0.0)
    h = jnp.dot(w2_ref[...], h.astype(jnp.bfloat16),
                preferred_element_type=jnp.float32)                      # (H2, Tn)
    h = jnp.maximum(h + b2_ref[...], 0.0)
    o_ref[...] = (jnp.dot(w3_ref[...], h.astype(jnp.bfloat16),
                          preferred_element_type=jnp.float32)
                  + b3_ref[...])                                         # (CO, Tn)


def fused_pi_mlp(enc_rows, goal_rows, params):
    """enc_rows: (Np, D1) rows for pi_op; goal_rows: (Ng, D2) rows for pi_op_goal.
    Returns (pi_out (Np,), goal_out (Ng,)) as f32."""
    w1t, b1, w2t, b2, w3t, b3 = params
    D_pad = w1t.shape[1]
    H1, H2, CO = w1t.shape[0], w2t.shape[0], w3t.shape[0]
    Np, D1 = enc_rows.shape
    Ng, D2 = goal_rows.shape
    n = Np + Ng

    # Tile policy: one grid step for n <= 2048 (overhead-bound regime), otherwise
    # 2048-wide lane-dense tiles (>= 2 steps so v7x megacore gets work).
    if n <= 2048:
        tile_n = _round_up(max(n, 256), 256)
        n_pad = tile_n
    else:
        tile_n = 2048
        n_pad = _round_up(n, tile_n)

    # Build the transposed, feature-padded, block-diagonal input DIRECTLY in bf16
    # (no f32 intermediate + separate XLA transpose/cast pass).
    xT = jnp.zeros((D_pad, n_pad), jnp.bfloat16)
    xT = xT.at[:D1, :Np].set(enc_rows.T.astype(jnp.bfloat16))
    xT = xT.at[D1:D1 + D2, Np:Np + Ng].set(goal_rows.T.astype(jnp.bfloat16))

    out = pl.pallas_call(
        _pi_mlp_kernel,
        out_shape=jax.ShapeDtypeStruct((CO, n_pad), jnp.float32),
        grid_spec=pltpu.PrefetchScalarGridSpec(
            num_scalar_prefetch=0,
            grid=(n_pad // tile_n,),
            in_specs=[
                pl.BlockSpec((D_pad, tile_n), lambda i: (0, i)),
                pl.BlockSpec((H1, D_pad), lambda i: (0, 0)),
                pl.BlockSpec((H1, 1), lambda i: (0, 0)),
                pl.BlockSpec((H2, H1), lambda i: (0, 0)),
                pl.BlockSpec((H2, 1), lambda i: (0, 0)),
                pl.BlockSpec((CO, H2), lambda i: (0, 0)),
                pl.BlockSpec((CO, 1), lambda i: (0, 0)),
            ],
            out_specs=pl.BlockSpec((CO, tile_n), lambda i: (0, i)),
        ),
        compiler_params=pltpu.CompilerParams(dimension_semantics=("parallel",)),
    )(xT, w1t, b1, w2t, b2, w3t, b3)

    pi_out = out[0, :Np]           # row 0 = pi_op head
    goal_out = out[1, Np:Np + Ng]  # row 1 = pi_op_goal head
    return pi_out, goal_out


# --------------------------------------------------------------------------
# Pallas kernel 2: sample_policy horizon propagation.
# The per-batch (Jp, Jp) transition matrix is built IN VMEM from pi/s_next
# (no HBM one-hot/T materialization); several batches per grid step amortize
# the per-step overhead; the horizon loop is fully unrolled.
# --------------------------------------------------------------------------
def _sample_policy_kernel(horizon, pi_ref, sn_ref, p0_ref, np_ref, seq_ref):
    Bp = pi_ref.shape[0]
    E = pi_ref.shape[2]
    Jp = p0_ref.shape[2]
    col = jax.lax.broadcasted_iota(jnp.int32, (Jp, Jp), 1)
    for b in range(Bp):                           # static unroll over block batches
        pi_b = pi_ref[b]                          # (Jp, E) f32, zero beyond 2M
        sn_b = sn_ref[b]                          # (Jp, E) int32, -1 beyond 2M
        # T[m, j] = sum_e pi[m,e] * [s_next[m,e] == j], built in VMEM.
        T = jnp.zeros((Jp, Jp), jnp.float32)
        for e in range(E):
            T = T + jnp.where(sn_b[:, e:e + 1] == col, pi_b[:, e:e + 1], 0.0)
        prob0 = p0_ref[b]                         # (1, Jp)
        seq = jnp.where(prob0 != 0.0, 1, 0).astype(jnp.int32)
        node_prob = prob0
        prev = prob0
        maxp = prob0
        for n in range(1, horizon):               # static unroll
            nxt = jnp.dot(prev, T, preferred_element_type=jnp.float32)   # (1, Jp)
            seq = jnp.where((nxt != 0.0) & (maxp < nxt), n + 1, seq)
            node_prob = node_prob + nxt
            maxp = jnp.maximum(maxp, nxt)
            prev = nxt
        np_ref[b] = node_prob
        seq_ref[b] = seq


def sample_policy_pallas(pi_pad, sn_pad, prob0_pad, horizon):
    B, Jp, E = pi_pad.shape
    Bp = min(B, 8)                                # batches per grid step
    B_pad = _round_up(B, Bp)
    if B_pad > B:
        pad = B_pad - B
        pi_pad = jnp.pad(pi_pad, ((0, pad), (0, 0), (0, 0)))
        sn_pad = jnp.pad(sn_pad, ((0, pad), (0, 0), (0, 0)), constant_values=-1)
        prob0_pad = jnp.pad(prob0_pad, ((0, pad), (0, 0), (0, 0)))
    node_prob, node_seq = pl.pallas_call(
        partial(_sample_policy_kernel, horizon),
        out_shape=(jax.ShapeDtypeStruct((B_pad, 1, Jp), jnp.float32),
                   jax.ShapeDtypeStruct((B_pad, 1, Jp), jnp.int32)),
        grid_spec=pltpu.PrefetchScalarGridSpec(
            num_scalar_prefetch=0,
            grid=(B_pad // Bp,),
            in_specs=[
                pl.BlockSpec((Bp, Jp, E), lambda b: (b, 0, 0)),
                pl.BlockSpec((Bp, Jp, E), lambda b: (b, 0, 0)),
                pl.BlockSpec((Bp, 1, Jp), lambda b: (b, 0, 0)),
            ],
            out_specs=(pl.BlockSpec((Bp, 1, Jp), lambda b: (b, 0, 0)),
                       pl.BlockSpec((Bp, 1, Jp), lambda b: (b, 0, 0))),
        ),
        compiler_params=pltpu.CompilerParams(dimension_semantics=("parallel",)),
    )(pi_pad, sn_pad, prob0_pad)
    return node_prob[:B], node_seq[:B]


# --------------------------------------------------------------------------
# Pallas kernel 3: NOI transformer-encoder layer + mean pooling, batched.
# TODO(synk): TransformerEncoder source not provided; synthesized as input-proj
# + PE + single-head self-attention (mask=True treated as valid key) + FFN with
# residuals + mean pooling over all tokens (noi_enc_layers=1, noi_n_head=1).
# --------------------------------------------------------------------------
def _noi_kernel(x_ref, m_ref, pe_ref, bd_ref, avg_ref, win_ref, bin_ref, wqkv_ref,
                wo_ref, w1_ref, b1_ref, w2_ref, b2_ref, o_ref):
    x = x_ref[0]                       # (R, Din) bf16
    keymask = m_ref[0]                 # (1, R) f32 (1 = valid key)
    h = jnp.dot(x, win_ref[...], preferred_element_type=jnp.float32) + bin_ref[...]
    h = h + pe_ref[...]                # (R, E) f32
    E = h.shape[-1]
    # fused QKV projection: one MXU call instead of three
    qkv = jnp.dot(h.astype(jnp.bfloat16), wqkv_ref[...],
                  preferred_element_type=jnp.float32)                    # (R, 3E)
    q = qkv[:, 0:E]
    k = qkv[:, E:2 * E]
    v = qkv[:, 2 * E:3 * E]
    scale = 1.0 / math.sqrt(E)
    # single block-diagonal masked attention over all Bt batches in the step
    s = jax.lax.dot_general(q.astype(jnp.bfloat16), k.astype(jnp.bfloat16),
                            (((1,), (1,)), ((), ())),
                            preferred_element_type=jnp.float32) * scale  # (R, R)
    keep = (bd_ref[...] > 0.0) & (keymask > 0.0)                         # (R, R)
    s = jnp.where(keep, s, -1e9)
    s = s - jnp.max(s, axis=-1, keepdims=True)
    p = jnp.exp(s) * keep.astype(jnp.float32)          # fully-masked rows -> 0
    denom = jnp.sum(p, axis=-1, keepdims=True)
    p = p / (denom + 1e-9)                             # exact reciprocal (EUP)
    attn = jnp.dot(p.astype(jnp.bfloat16), v.astype(jnp.bfloat16),
                   preferred_element_type=jnp.float32)                   # (R, E)
    h = h + jnp.dot(attn.astype(jnp.bfloat16), wo_ref[...],
                    preferred_element_type=jnp.float32)
    f = jnp.maximum(jnp.dot(h.astype(jnp.bfloat16), w1_ref[...],
                            preferred_element_type=jnp.float32) + b1_ref[...], 0.0)
    h = h + jnp.dot(f.astype(jnp.bfloat16), w2_ref[...],
                    preferred_element_type=jnp.float32) + b2_ref[...]
    # TODO(synk): mean pooling over all num_noi tokens (mask only gates attention
    # keys); single (Bt, R) x (R, E) averaging matmul instead of per-batch loop.
    o_ref[0] = jnp.dot(avg_ref[...], h, preferred_element_type=jnp.float32)


def noi_encoder_forward(x, mask, params):
    """x: (B, N, Din) f32, mask: (B, N) bool -> (B, E) f32."""
    win, bin_, pe, wqkv, wo, w1, b1, w2, b2 = params
    B, N, din = x.shape
    E, F = win.shape[1], w1.shape[1]
    # Pack enough batches per grid step to carry ~128 token rows (amortizes the
    # per-step overhead / DMA); for small B this collapses to a single step.
    Bt = max(1, min(B, max(1, 128 // N)))
    B_pad = _round_up(B, Bt)
    nblk = B_pad // Bt
    R = Bt * N
    xp = jnp.pad(x, ((0, B_pad - B), (0, 0), (0, 0))).astype(jnp.bfloat16)
    mp = jnp.pad(mask.astype(jnp.float32), ((0, B_pad - B), (0, 0)))
    x_blocks = xp.reshape(nblk, R, din)
    m_blocks = mp.reshape(nblk, 1, R)
    pe_tiled = jnp.tile(pe, (Bt, 1))                       # (R, E) f32
    # constant block-diagonal attention mask + per-batch averaging matrix
    ids = jnp.repeat(jnp.arange(Bt), N)                    # (R,)
    bd = (ids[:, None] == ids[None, :]).astype(jnp.float32)           # (R, R)
    avg = (jnp.arange(Bt)[:, None] == ids[None, :]).astype(jnp.float32) / N  # (Bt,R)

    out = pl.pallas_call(
        _noi_kernel,
        out_shape=jax.ShapeDtypeStruct((nblk, Bt, E), jnp.float32),
        grid_spec=pltpu.PrefetchScalarGridSpec(
            num_scalar_prefetch=0,
            grid=(nblk,),
            in_specs=[
                pl.BlockSpec((1, R, din), lambda i: (i, 0, 0)),
                pl.BlockSpec((1, 1, R), lambda i: (i, 0, 0)),
                pl.BlockSpec((R, E), lambda i: (0, 0)),
                pl.BlockSpec((R, R), lambda i: (0, 0)),
                pl.BlockSpec((Bt, R), lambda i: (0, 0)),
                pl.BlockSpec((din, E), lambda i: (0, 0)),
                pl.BlockSpec((1, E), lambda i: (0, 0)),
                pl.BlockSpec((E, 3 * E), lambda i: (0, 0)),
                pl.BlockSpec((E, E), lambda i: (0, 0)),
                pl.BlockSpec((E, F), lambda i: (0, 0)),
                pl.BlockSpec((1, F), lambda i: (0, 0)),
                pl.BlockSpec((F, E), lambda i: (0, 0)),
                pl.BlockSpec((1, E), lambda i: (0, 0)),
            ],
            out_specs=pl.BlockSpec((1, Bt, E), lambda i: (i, 0, 0)),
        ),
        compiler_params=pltpu.CompilerParams(dimension_semantics=("parallel",)),
    )(x_blocks, m_blocks, pe_tiled, bd, avg, win, bin_, wqkv, wo, w1, b1, w2, b2)
    return out.reshape(B_pad, E)[:B]


# --------------------------------------------------------------------------
# Selector module (JAX glue around the Pallas kernels)
# --------------------------------------------------------------------------
class Selector:
    def __init__(self, args, key):
        self.horizon = args['horizon']
        self.num_noi = args['num_noi']
        dn, dt = args['node_enc_size'], args['target_agent_enc_size']
        h1, h2 = args['pi_h1_size'], args['pi_h2_size']
        e_noi = args['noi_enc_size']
        keys = jax.random.split(key, 16)

        def lin(k, di, do, scale=0.1):
            kw, kb = jax.random.split(k)
            return (jax.random.normal(kw, (di, do), jnp.float32) * scale,
                    jax.random.normal(kb, (1, do), jnp.float32) * scale)

        # raw per-MLP weights
        w1, b1 = lin(keys[0], 2 * dn + dt + 2, h1)
        w2, b2 = lin(keys[1], h1, h2)
        w3, b3 = lin(keys[2], h2, 1)
        g1, gb1 = lin(keys[3], dn + dt, h1)
        g2, gb2 = lin(keys[4], h1, h2)
        g3, gb3 = lin(keys[5], h2, 1)

        # fused block-diagonal, transposed weights (bf16).  Hidden dims are only
        # padded to a sublane multiple of 2*h (not 128) to cut zero VPU work and
        # weight traffic; contraction dim padded to 128 lanes.
        d1, d2 = 2 * dn + dt + 2, dn + dt
        d_pad = _round_up(d1 + d2, 128)
        H1 = max(8, _round_up(2 * h1, 8))
        H2 = max(8, _round_up(2 * h2, 8))
        CO = 8
        W1t = jnp.zeros((H1, d_pad), jnp.float32)
        W1t = W1t.at[0:h1, 0:d1].set(w1.T)
        W1t = W1t.at[h1:2 * h1, d1:d1 + d2].set(g1.T)
        B1c = jnp.zeros((H1, 1), jnp.float32)
        B1c = B1c.at[0:h1, 0].set(b1[0]).at[h1:2 * h1, 0].set(gb1[0])
        W2t = jnp.zeros((H2, H1), jnp.float32)
        W2t = W2t.at[0:h2, 0:h1].set(w2.T)
        W2t = W2t.at[h2:2 * h2, h1:2 * h1].set(g2.T)
        B2c = jnp.zeros((H2, 1), jnp.float32)
        B2c = B2c.at[0:h2, 0].set(b2[0]).at[h2:2 * h2, 0].set(gb2[0])
        W3t = jnp.zeros((CO, H2), jnp.float32)
        W3t = W3t.at[0, 0:h2].set(w3[:, 0])
        W3t = W3t.at[1, h2:2 * h2].set(g3[:, 0])
        B3c = jnp.zeros((CO, 1), jnp.float32)
        B3c = B3c.at[0, 0].set(b3[0, 0]).at[1, 0].set(gb3[0, 0])
        self.pi_combined = (W1t.astype(jnp.bfloat16), B1c,
                            W2t.astype(jnp.bfloat16), B2c,
                            W3t.astype(jnp.bfloat16), B3c)

        # TODO(synk): NOIEmbedding source not provided; modeled as a learned
        # embedding table (num_noi + 1, node_enc_size) indexed by clipped visit step.
        self.noi_pos_emb = jax.random.normal(keys[6], (self.num_noi + 1, dn),
                                             jnp.float32) * 0.1

        win, bin_ = lin(keys[7], dn + dt, e_noi)
        pe = jax.random.normal(keys[8], (self.num_noi, e_noi), jnp.float32) * 0.1
        wq, _ = lin(keys[9], e_noi, e_noi)
        wk, _ = lin(keys[10], e_noi, e_noi)
        wv, _ = lin(keys[11], e_noi, e_noi)
        wo, _ = lin(keys[12], e_noi, e_noi)
        wf1, bf1 = lin(keys[13], e_noi, 2 * e_noi)
        wf2, bf2 = lin(keys[14], 2 * e_noi, e_noi)
        wqkv = jnp.concatenate([wq, wk, wv], axis=1)           # fused QKV (E, 3E)
        self.noi_encoder = (win.astype(jnp.bfloat16), bin_, pe,
                            wqkv.astype(jnp.bfloat16), wo.astype(jnp.bfloat16),
                            wf1.astype(jnp.bfloat16), bf1,
                            wf2.astype(jnp.bfloat16), bf2)

    # ----------------------- compute_policy -----------------------
    def compute_policy(self, target_agent_encoding, node_encodings, node_masks,
                       s_next, edge_type):
        B, M, dn = node_encodings.shape
        nbr = s_next.shape[2] - 1
        dt = target_agent_encoding.shape[1]

        # feature assembly in bf16 (halves the broadcast-heavy materialization)
        node_enc_b = node_encodings.astype(jnp.bfloat16)
        tgt_b = target_agent_encoding.astype(jnp.bfloat16)

        dst_idcs = s_next[:, :, :-1].astype(jnp.int32)
        dst_node_enc = jnp.take_along_axis(
            node_enc_b,
            jnp.broadcast_to(dst_idcs.reshape(B, M * nbr, 1), (B, M * nbr, dn)),
            axis=1).reshape(B, M, nbr, dn)
        src_node_enc = jnp.broadcast_to(node_enc_b[:, :, None, :], (B, M, nbr, dn))
        tgt_enc = jnp.broadcast_to(tgt_b[:, None, None, :], (B, M, nbr, dt))
        edge_enc = jnp.concatenate(
            [(edge_type[:, :, :-1] == 1).astype(jnp.bfloat16)[..., None],
             (edge_type[:, :, :-1] == 2).astype(jnp.bfloat16)[..., None]], axis=3)

        enc = jnp.concatenate([tgt_enc, src_node_enc, dst_node_enc, edge_enc], axis=3)
        enc_goal = jnp.concatenate([tgt_enc[:, :, 0, :], src_node_enc[:, :, 0, :]], axis=2)

        masks = jnp.sum(edge_enc.astype(jnp.float32), axis=3, keepdims=True) != 0
        masks_goal = ~(node_masks.astype(bool))[:, :, None]

        # masked_select -> MLP -> masked_scatter == run the MLP on all rows, zero
        # the masked-out entries (identical to the PyTorch zeros + masked_scatter_).
        pi_rows, goal_rows = fused_pi_mlp(enc.reshape(B * M * nbr, -1),
                                          enc_goal.reshape(B * M, -1),
                                          self.pi_combined)
        pi = jnp.where(masks, pi_rows.reshape(B, M, nbr, 1), 0.0)[..., 0]
        pi_goal = jnp.where(masks_goal, goal_rows.reshape(B, M, 1), 0.0)

        pi = jnp.concatenate([pi, pi_goal], axis=-1)
        op_masks = jnp.log((edge_type != 0).astype(jnp.float32))
        return jax.nn.log_softmax(pi + op_masks, axis=2)

    # ----------------------- sample_policy -----------------------
    def sample_policy(self, pi, s_next, init_node):
        B, M, E = pi.shape
        two_m = 2 * M
        pi_exp = jnp.nan_to_num(jnp.exp(pi), nan=0.0)
        pi_dummy = jnp.zeros_like(pi_exp).at[:, :, -1].set(1.0)
        pi_full = jnp.concatenate([pi_exp, pi_dummy], axis=1)              # (B, 2M, E)

        snext_dummy = jnp.zeros_like(s_next).at[:, :, -1].set(
            (M + jnp.arange(M)).astype(s_next.dtype)[None, :])
        snext_full = jnp.concatenate([s_next, snext_dummy], axis=1).astype(jnp.int32)

        prob0 = jnp.where(init_node != 0, 1.0, 0.0)
        prob0_full = jnp.concatenate([prob0, jnp.zeros_like(prob0)], axis=1)

        # pad node axis to 128 lanes; T is built INSIDE the kernel (no HBM one-hot)
        Jp = _round_up(two_m, 128)
        pi_pad = jnp.pad(pi_full, ((0, 0), (0, Jp - two_m), (0, 0)))
        sn_pad = jnp.pad(snext_full, ((0, 0), (0, Jp - two_m), (0, 0)),
                         constant_values=-1)
        prob0_pad = jnp.pad(prob0_full, ((0, 0), (0, Jp - two_m))).reshape(B, 1, Jp)

        node_prob, node_seq = sample_policy_pallas(pi_pad, sn_pad, prob0_pad,
                                                   self.horizon)
        return node_prob[:, 0, :M], node_seq[:, 0, :M]

    # ----------------------- aggregate -----------------------
    def aggregate(self, node_prob, node_sequence, node_encodings, target_agent_encoding):
        B, M, dn = node_encodings.shape
        _, noi_idx = jax.lax.top_k(node_prob, self.num_noi)
        noi_sequence = jnp.take_along_axis(node_sequence, noi_idx, axis=1)
        noi_encodings = jnp.take_along_axis(
            node_encodings,
            jnp.broadcast_to(noi_idx[:, :, None], (B, self.num_noi, dn)), axis=1)
        emb_idx = jnp.clip(noi_sequence, 0, self.num_noi)
        noi_encodings = noi_encodings + self.noi_pos_emb[emb_idx]
        noi_mask = noi_sequence != 0
        tgt = jnp.broadcast_to(target_agent_encoding[:, None, :],
                               (B, self.num_noi, target_agent_encoding.shape[1]))
        noi_encodings = jnp.concatenate([noi_encodings, tgt], axis=-1)
        agg_enc = noi_encoder_forward(noi_encodings, noi_mask, self.noi_encoder)
        return agg_enc, noi_mask

    # ----------------------- forward -----------------------
    def forward(self, encodings):
        target_agent_encoding = encodings['target_agent_encoding']
        node_encodings = encodings['context_encoding']['combined']
        node_masks = encodings['context_encoding']['combined_masks']
        s_next = encodings['s_next']
        edge_type = encodings['edge_type']
        pi = self.compute_policy(target_agent_encoding, node_encodings, node_masks,
                                 s_next, edge_type)
        init_node = encodings['init_node']
        node_prob, node_sequence = self.sample_policy(pi, s_next, init_node)
        agg_enc, noi_mask = self.aggregate(node_prob, node_sequence,
                                           node_encodings, target_agent_encoding)
        outputs = dict(encodings)
        outputs.update({'agg_encoding': agg_enc, 'noi_mask': noi_mask, 'pi': pi})
        return outputs


if __name__ == "__main__":
    args = dict(node_enc_size=32, target_agent_enc_size=32, pi_h1_size=32,
                pi_h2_size=32, activation='relu', horizon=4, num_noi=4,
                noi_enc_size=32, noi_n_head=1, noi_enc_layers=1,
                noi_pooling='mean', noi_pe=True)
    key = jax.random.PRNGKey(0)
    k_param, k_data = jax.random.split(key)
    selector = Selector(args, k_param)

    B, M, NBR = 2, 16, 4
    kd = jax.random.split(k_data, 6)
    target_agent_encoding = jax.random.normal(
        kd[0], (B, args['target_agent_enc_size']), jnp.float32)
    node_encodings = jax.random.normal(
        kd[1], (B, M, args['node_enc_size']), jnp.float32)
    node_masks = jnp.zeros((B, M), jnp.float32).at[:, M - 3:].set(1.0)  # 1 = padded
    nbr_idx = jax.random.randint(kd[2], (B, M, NBR), 0, M)
    goal_idx = jnp.broadcast_to((M + jnp.arange(M))[None, :, None], (B, M, 1))
    s_next = jnp.concatenate(
        [nbr_idx.astype(jnp.float32), goal_idx.astype(jnp.float32)], axis=-1)
    edge_type = jnp.concatenate(
        [jax.random.randint(kd[3], (B, M, NBR), 0, 3),
         jnp.full((B, M, 1), 3, jnp.int32)], axis=-1)
    init_node = jnp.zeros((B, M), jnp.float32).at[:, 0].set(1.0)

    encodings = {
        'target_agent_encoding': target_agent_encoding,
        'context_encoding': {'combined': node_encodings,
                             'combined_masks': node_masks},
        's_next': s_next,
        'edge_type': edge_type,
        'init_node': init_node,
    }

    outputs = selector.forward(encodings)
    jax.block_until_ready((outputs['agg_encoding'], outputs['noi_mask'], outputs['pi']))
    print("KERNEL_OK")
</pallas_src>

<mosaic_0001>
module attributes {stable_mosaic.version = 11 : i64} {
  func.func @_pi_mlp_kernel(%arg0: i32, %arg1: memref<256x256xbf16, #tpu.memory_space<vmem>>, %arg2: memref<64x256xbf16, #tpu.memory_space<vmem>>, %arg3: memref<64x1xf32, #tpu.memory_space<vmem>>, %arg4: memref<64x64xbf16, #tpu.memory_space<vmem>>, %arg5: memref<64x1xf32, #tpu.memory_space<vmem>>, %arg6: memref<8x64xbf16, #tpu.memory_space<vmem>>, %arg7: memref<8x1xf32, #tpu.memory_space<vmem>>, %arg8: memref<8x256xf32, #tpu.memory_space<vmem>>) attributes {dimension_semantics = [#tpu.dimension_semantics<parallel>], iteration_bounds = array<i64: 1>, scalar_prefetch = 0 : i64, scratch_operands = 0 : i64, tpu.core_type = #tpu.core_type<tc>, window_params = [{transform_indices = @transform_0, window_bounds = array<i64: 256, 256>}, {pipeline_mode = #tpu.pipeline_mode<synchronous>, transform_indices = @transform_1, window_bounds = array<i64: 64, 256>}, {pipeline_mode = #tpu.pipeline_mode<synchronous>, transform_indices = @transform_2, window_bounds = array<i64: 64, 1>}, {pipeline_mode = #tpu.pipeline_mode<synchronous>, transform_indices = @transform_3, window_bounds = array<i64: 64, 64>}, {pipeline_mode = #tpu.pipeline_mode<synchronous>, transform_indices = @transform_4, window_bounds = array<i64: 64, 1>}, {pipeline_mode = #tpu.pipeline_mode<synchronous>, transform_indices = @transform_5, window_bounds = array<i64: 8, 64>}, {pipeline_mode = #tpu.pipeline_mode<synchronous>, transform_indices = @transform_6, window_bounds = array<i64: 8, 1>}, {transform_indices = @transform_7, window_bounds = array<i64: 8, 256>}]} {
    %c0 = arith.constant 0 : index
    %c0_0 = arith.constant 0 : index
    %0 = vector.load %arg1[%c0, %c0_0] : memref<256x256xbf16, #tpu.memory_space<vmem>>, vector<256x256xbf16>
    %c0_1 = arith.constant 0 : index
    %c0_2 = arith.constant 0 : index
    %1 = vector.load %arg2[%c0_1, %c0_2] : memref<64x256xbf16, #tpu.memory_space<vmem>>, vector<64x256xbf16>
    %cst = arith.constant dense<0.000000e+00> : vector<64x256xf32>
    %2 = tpu.matmul %1, %0, %cst {dimension_numbers = #tpu.dot_dimension_numbers<[1], [0], [0], [1], [0, 0, 1, 1], [], []>} : vector<64x256xbf16>, vector<256x256xbf16>, vector<64x256xf32> -> vector<64x256xf32>
    %c0_3 = arith.constant 0 : index
    %c0_4 = arith.constant 0 : index
    %3 = vector.load %arg3[%c0_3, %c0_4] : memref<64x1xf32, #tpu.memory_space<vmem>>, vector<64x1xf32>
    %4 = vector.broadcast %3 : vector<64x1xf32> to vector<64x256xf32>
    %5 = arith.addf %2, %4 : vector<64x256xf32>
    %cst_5 = arith.constant 0.000000e+00 : f32
    %6 = vector.broadcast %cst_5 : f32 to vector<64x256xf32>
    %7 = arith.maximumf %5, %6 : vector<64x256xf32>
    %c0_6 = arith.constant 0 : index
    %c0_7 = arith.constant 0 : index
    %8 = vector.load %arg4[%c0_6, %c0_7] : memref<64x64xbf16, #tpu.memory_space<vmem>>, vector<64x64xbf16>
    %9 = arith.truncf %7 : vector<64x256xf32> to vector<64x256xbf16>
    %cst_8 = arith.constant dense<0.000000e+00> : vector<64x256xf32>
    %10 = tpu.matmul %8, %9, %cst_8 {dimension_numbers = #tpu.dot_dimension_numbers<[1], [0], [0], [1], [0, 0, 1, 1], [], []>} : vector<64x64xbf16>, vector<64x256xbf16>, vector<64x256xf32> -> vector<64x256xf32>
    %c0_9 = arith.constant 0 : index
    %c0_10 = arith.constant 0 : index
    %11 = vector.load %arg5[%c0_9, %c0_10] : memref<64x1xf32, #tpu.memory_space<vmem>>, vector<64x1xf32>
    %12 = vector.broadcast %11 : vector<64x1xf32> to vector<64x256xf32>
    %13 = arith.addf %10, %12 : vector<64x256xf32>
    %cst_11 = arith.constant 0.000000e+00 : f32
    %14 = vector.broadcast %cst_11 : f32 to vector<64x256xf32>
    %15 = arith.maximumf %13, %14 : vector<64x256xf32>
    %c0_12 = arith.constant 0 : index
    %c0_13 = arith.constant 0 : index
    %16 = vector.load %arg6[%c0_12, %c0_13] : memref<8x64xbf16, #tpu.memory_space<vmem>>, vector<8x64xbf16>
    %17 = arith.truncf %15 : vector<64x256xf32> to vector<64x256xbf16>
    %cst_14 = arith.constant dense<0.000000e+00> : vector<8x256xf32>
    %18 = tpu.matmul %16, %17, %cst_14 {dimension_numbers = #tpu.dot_dimension_numbers<[1], [0], [0], [1], [0, 0, 1, 1], [], []>} : vector<8x64xbf16>, vector<64x256xbf16>, vector<8x256xf32> -> vector<8x256xf32>
    %c0_15 = arith.constant 0 : index
    %c0_16 = arith.constant 0 : index
    %19 = vector.load %arg7[%c0_15, %c0_16] : memref<8x1xf32, #tpu.memory_space<vmem>>, vector<8x1xf32>
    %20 = vector.broadcast %19 : vector<8x1xf32> to vector<8x256xf32>
    %21 = arith.addf %18, %20 : vector<8x256xf32>
    %c0_17 = arith.constant 0 : index
    %c0_18 = arith.constant 0 : index
    %22 = vector.load %arg8[%c0_17, %c0_18] : memref<8x256xf32, #tpu.memory_space<vmem>>, vector<8x256xf32>
    tpu.vector_store %arg8[%c0_17, %c0_18], %21 {strides = array<i32>} : memref<8x256xf32, #tpu.memory_space<vmem>>, vector<8x256xf32>,
    return
  }
  func.func @transform_0(%arg0: i32) -> (i32, i32) {
    %c0_i32 = arith.constant 0 : i32
    %c0_i32_0 = arith.constant 0 : i32
    return %c0_i32, %arg0 : i32, i32
  }
  func.func @transform_1(%arg0: i32) -> (i32, i32) {
    %c0_i32 = arith.constant 0 : i32
    %c0_i32_0 = arith.constant 0 : i32
    %c0_i32_1 = arith.constant 0 : i32
    return %c0_i32, %c0_i32_0 : i32, i32
  }
  func.func @transform_2(%arg0: i32) -> (i32, i32) {
    %c0_i32 = arith.constant 0 : i32
    %c0_i32_0 = arith.constant 0 : i32
    %c0_i32_1 = arith.constant 0 : i32
    return %c0_i32, %c0_i32_0 : i32, i32
  }
  func.func @transform_3(%arg0: i32) -> (i32, i32) {
    %c0_i32 = arith.constant 0 : i32
    %c0_i32_0 = arith.constant 0 : i32
    %c0_i32_1 = arith.constant 0 : i32
    return %c0_i32, %c0_i32_0 : i32, i32
  }
  func.func @transform_4(%arg0: i32) -> (i32, i32) {
    %c0_i32 = arith.constant 0 : i32
    %c0_i32_0 = arith.constant 0 : i32
    %c0_i32_1 = arith.constant 0 : i32
    return %c0_i32, %c0_i32_0 : i32, i32
  }
  func.func @transform_5(%arg0: i32) -> (i32, i32) {
    %c0_i32 = arith.constant 0 : i32
    %c0_i32_0 = arith.constant 0 : i32
    %c0_i32_1 = arith.constant 0 : i32
    return %c0_i32, %c0_i32_0 : i32, i32
  }
  func.func @transform_6(%arg0: i32) -> (i32, i32) {
    %c0_i32 = arith.constant 0 : i32
    %c0_i32_0 = arith.constant 0 : i32
    %c0_i32_1 = arith.constant 0 : i32
    return %c0_i32, %c0_i32_0 : i32, i32
  }
  func.func @transform_7(%arg0: i32) -> (i32, i32) {
    %c0_i32 = arith.constant 0 : i32
    %c0_i32_0 = arith.constant 0 : i32
    return %c0_i32, %arg0 : i32, i32
  }
}

</mosaic_0001>

<bundles_post_ra>
// kernel: tpu_custom_call.1
= control target key start
LH: loop header
LB: loop body
LE: loop exit
PB: predicated region body
PF: predicated region fallthrough
CT: control target
= control target key end

     0   :  { %12 = vsyncpa [#allocation3], 0  ;;  %s998_s0 = inlined_call_operand.hbm [shape: bf16[256,256], index: 0, kind: input, shape index: {}]   ;;  %s999_s1 = inlined_call_operand.vmem [shape: bf16[64,256], index: 1, kind: input, shape index: {}]   ;;  %s1000_s2 = inlined_call_operand.vmem [shape: f32[64,1], index: 2, kind: input, shape index: {}]   ;;  %s1001_s3 = inlined_call_operand.vmem [shape: bf16[64,64], index: 3, kind: input, shape index: {}]   ;;  %s1002_s4 = inlined_call_operand.vmem [shape: f32[64,1], index: 4, kind: input, shape index: {}]   ;;  %s1003_s5 = inlined_call_operand.vmem [shape: bf16[8,64], index: 5, kind: input, shape index: {}]   ;;  %s1004_s6 = inlined_call_operand.vmem [shape: f32[8,1], index: 6, kind: input, shape index: {}]   ;;  %s1005_s7 = inlined_call_operand.hbm [shape: f32[8,256], index: 7, kind: output, shape index: {}]  }
   0x1   :  { %13 = vsyncpa [#allocation4], 0  ;;  %s845_s24 = smov [#allocation2]  }
   0x2   :  { %s19_s25 = sshll.u32 %s845_s24, 4  ;;  %s20_s25 = int_to_ptr.vmem [resolvable:$true] %s19_s25 }
   0x3   :  { %s809_s26 = scalar_lea.vmem %s20_s25, 4096  ;;  %p814_p1 = scmp.lt.s32.totalorder %s20_s25, %s20_s25 }
   0x4   :  { %p810_p0 = scmp.ne.s32.totalorder %s20_s25, %s809_s26  ;;  %p815_p2 = scmp.lt.s32.totalorder %s809_s26, %s809_s26 }
   0x6   :  { %p816_p3 = por %p815_p2, %p814_p1 }
   0x8   :  { %p817_p4 = pnand %p816_p3, %p810_p0 }
   0xa   :  { %820 = shalt.err (!%p817_p4)
}
   0xb   :  { %s846_s27 = smov 128   ;;  %s847_s28 = smov 8  }
   0xc   :  { %25 = dma.hbm_to_vmem [thread:$0]  %s998_s0, 4096, %s20_s25, [#allocation3], %s846_s27, %s846_s27, %s847_s28  }
   0xd   :  { %841 = dma.done.wait [#allocation3], 4096  }
   0xe   :  { %842 = vsyncadd [#allocation3], 4294963200  ;;  %v848_v0 = vmov 0   ;;  %v737_v1 = vld [vmem:[#allocation2 + $0x74] ss:$8 sps:$4 sm:$0xff]   ;;  %v86_v19 = vld [vmem:[%s1000_s2 + $0x20] sm:$0xff] }
   0xf   :  { %735 = vset.pattern.permute.xlu0 %v848_v0  ;;  %736 = vset.pattern.permute.xlu1 %v848_v0  ;;  %v739_v2 = vld [vmem:[#allocation2 + $0x70] ss:$8 sps:$4 sm:$0xff]   ;;  %v740_v3 = vld [vmem:[#allocation2 + $0x64] ss:$8 sps:$4 sm:$0xff]   ;;  %v742_v4 = vld [vmem:[#allocation2 + $0x60] ss:$8 sps:$4 sm:$0xff]  }
  0x10   :  { %548 = vmatprep.mubr.bf16.mxu1 %v848_v0  ;;  %330 = vmatprep.subr.bf16.mxu0 %v737_v1  ;;  %v743_v5 = vld [vmem:[#allocation2 + $0x54] ss:$8 sps:$4 sm:$0xff]   ;;  %v745_v6 = vld [vmem:[#allocation2 + $0x50] ss:$8 sps:$4 sm:$0xff]   ;;  %v746_v7 = vld [vmem:[#allocation2 + $0x44] ss:$8 sps:$4 sm:$0xff]  }
  0x11   :  { %331 = vmatpush1.bf16.msra.mxu0 %v739_v2  ;;  %v748_v8 = vld [vmem:[#allocation2 + $0x40] ss:$8 sps:$4 sm:$0xff]   ;;  %v749_v9 = vld [vmem:[#allocation2 + $0x34] ss:$8 sps:$4 sm:$0xff]   ;;  %v751_v10 = vld [vmem:[#allocation2 + $0x30] ss:$8 sps:$4 sm:$0xff]   ;;  %112 = vperm.xlu1 %736, %v86_v19  }
  0x12   :  { %332 = vmatprep.subr.bf16.mxu0 %v740_v3  ;;  %v752_v11 = vld [vmem:[#allocation2 + $0x24] ss:$8 sps:$4 sm:$0xff]   ;;  %v754_v12 = vld [vmem:[#allocation2 + $0x20] ss:$8 sps:$4 sm:$0xff]   ;;  %v755_v13 = vld [vmem:[#allocation2 + $0x14] ss:$8 sps:$4 sm:$0xff]  }
  0x13   :  { %v787_v14 = vld [vmem:[%s999_s1 + $0x4] ss:$8 sps:$4 sm:$0xff]   ;;  %v757_v15 = vld [vmem:[#allocation2 + $0x10] ss:$8 sps:$4 sm:$0xff]   ;;  %v760_v18 = vld [vmem:[#allocation2] ss:$8 sps:$4 sm:$0xff]  }
  0x14   :  { %v758_v16 = vld [vmem:[#allocation2 + $0x4] ss:$8 sps:$4 sm:$0xff]   ;;  %362 = vmatprep.mubr.bf16.mxu0 %v787_v14  ;;  %v88_v17 = vld [vmem:[%s1000_s2 + $0x30] sm:$0xff]  ;;  %v89_v21 = vld [vmem:[%s1000_s2 + $0x38] sm:$0xff]  ;;  %vm503_vm0 = vcmask 523264   ;;  %s849_s13 = smov [#allocation5]  }
  0x15   :  { %333 = vmatpush1.bf16.msra.mxu0 %v742_v4  ;;  %122 = vperm.xlu0 %735, %v88_v17   ;;  %v761_v20 = vld [vmem:[#allocation2 + $0xf4] ss:$8 sps:$4 sm:$0xff]   ;;  %v87_v22 = vld [vmem:[%s1000_s2 + $0x28] sm:$0xff]  ;;  %v763_v23 = vld [vmem:[#allocation2 + $0xf0] ss:$8 sps:$4 sm:$0xff]   ;;  %s672_s14 = sshll.u32 %s849_s13, 4  ;;  %s673_s14 = int_to_ptr.vmem [resolvable:$true] %s672_s14 }
  0x16   :  { %334 = vmatprep.subr.bf16.mxu0 %v743_v5  ;;  %v764_v24 = vld [vmem:[#allocation2 + $0xe4] ss:$8 sps:$4 sm:$0xff]   ;;  %v84_v25 = vld [vmem:[%s1000_s2 + $0x10] sm:$0xff]  ;;  %117 = vperm.xlu1 %736, %v87_v22   ;;  %v85_v26 = vld [vmem:[%s1000_s2 + $0x18] sm:$0xff]  ;;  %s821_s15 = scalar_lea.vmem %s673_s14, 256  ;;  %p826_p6 = scmp.lt.s32.totalorder %s673_s14, %s673_s14 }
  0x17   :  { %v766_v27 = vld [vmem:[#allocation2 + $0xe0] ss:$8 sps:$4 sm:$0xff]   ;;  %v767_v28 = vld [vmem:[#allocation2 + $0xd4] ss:$8 sps:$4 sm:$0xff]   ;;  %v769_v31 = vld [vmem:[#allocation2 + $0xd0] ss:$8 sps:$4 sm:$0xff]   ;;  %p822_p5 = scmp.ne.s32.totalorder %s673_s14, %s821_s15  ;;  %p827_p7 = scmp.lt.s32.totalorder %s821_s15, %s821_s15 }
  0x18   :  { %v82_v29 = vld [vmem:[%s1000_s2] sm:$0xff]  ;;  %v83_v30 = vld [vmem:[%s1000_s2 + $0x8] sm:$0xff]  ;;  %v441_v33 = vld [vmem:[%s1002_s4 + $0x30] sm:$0xff] }
  0x19   :  { %335 = vmatpush1.bf16.msra.mxu0 %v745_v6  ;;  %127 = vperm.xlu0 %735, %v89_v21   ;;  %v770_v32 = vld [vmem:[#allocation2 + $0xc4] ss:$8 sps:$4 sm:$0xff]   ;;  %v442_v34 = vld [vmem:[%s1002_s4 + $0x38] sm:$0xff]  ;;  %v772_v35 = vld [vmem:[#allocation2 + $0xc0] ss:$8 sps:$4 sm:$0xff]   ;;  %p828_p8 = por %p827_p7, %p826_p6 }
  0x1a   :  { %336 = vmatprep.subr.bf16.mxu0 %v746_v7  ;;  %107 = vperm.xlu1 %736, %v85_v26   ;;  %v773_v36 = vld [vmem:[#allocation2 + $0xb4] ss:$8 sps:$4 sm:$0xff]   ;;  %v439_v37 = vld [vmem:[%s1002_s4 + $0x20] sm:$0xff]  ;;  %v440_v38 = vld [vmem:[%s1002_s4 + $0x28] sm:$0xff] }
  0x1b   :  { %v775_v39 = vld [vmem:[#allocation2 + $0xb0] ss:$8 sps:$4 sm:$0xff]   ;;  %v776_v40 = vld [vmem:[#allocation2 + $0xa4] ss:$8 sps:$4 sm:$0xff]   ;;  %v778_v43 = vld [vmem:[#allocation2 + $0xa0] ss:$8 sps:$4 sm:$0xff]   ;;  %p829_p9 = pnand %p828_p8, %p822_p5 }
  0x1c   :  { %v437_v41 = vld [vmem:[%s1002_s4 + $0x10] sm:$0xff]  ;;  %v438_v42 = vld [vmem:[%s1002_s4 + $0x18] sm:$0xff]  ;;  %v435_v45 = vld [vmem:[%s1002_s4] sm:$0xff] }
  0x1d   :  { %337 = vmatpush1.bf16.msra.mxu0 %v748_v8  ;;  %102 = vperm.xlu0 %735, %v84_v25   ;;  %v779_v44 = vld [vmem:[#allocation2 + $0x94] ss:$8 sps:$4 sm:$0xff]   ;;  %v436_v46 = vld [vmem:[%s1002_s4 + $0x8] sm:$0xff]  ;;  %v781_v47 = vld [vmem:[#allocation2 + $0x90] ss:$8 sps:$4 sm:$0xff]  }
  0x1e   :  { %338 = vmatprep.subr.bf16.mxu0 %v749_v9  ;;  %97 = vperm.xlu1 %736, %v83_v30   ;;  %v782_v48 = vld [vmem:[#allocation2 + $0x84] ss:$8 sps:$4 sm:$0xff]   ;;  %v784_v50 = vld [vmem:[#allocation2 + $0x80] ss:$8 sps:$4 sm:$0xff]   ;;  %v788_v52 = vld [vmem:[%s999_s1 + $0x14] ss:$8 sps:$4 sm:$0xff]  }
  0x1f   :  { %v614_v49 = vld [vmem:[%s1004_s6] sm:$0xff]  ;;  %v790_v53 = vld [vmem:[%s999_s1 + $0x10] ss:$8 sps:$4 sm:$0xff]   ;;  %v794_v56 = vld [vmem:[%s999_s1 + $0x34] ss:$8 sps:$4 sm:$0xff]  }
  0x20   :  { %v785_v51 = vld [vmem:[%s999_s1] ss:$8 sps:$4 sm:$0xff]   ;;  %v791_v54 = vld [vmem:[%s999_s1 + $0x24] ss:$8 sps:$4 sm:$0xff]   ;;  %v796_v57 = vld [vmem:[%s999_s1 + $0x30] ss:$8 sps:$4 sm:$0xff]  }
  0x21   :  { %339 = vmatpush1.bf16.msra.mxu0 %v751_v10  ;;  %92 = vperm.xlu0 %735, %v82_v29   ;;  %v793_v55 = vld [vmem:[%s999_s1 + $0x20] ss:$8 sps:$4 sm:$0xff]  }
  0x22   :  { %340 = vmatprep.subr.bf16.mxu0 %v752_v11  ;;  %480 = vperm.xlu1 %736, %v442_v34  }
  0x25   :  { %341 = vmatpush1.bf16.msra.mxu0 %v754_v12  ;;  %475 = vperm.xlu0 %735, %v441_v33  }
  0x26   :  { %342 = vmatprep.subr.bf16.mxu0 %v755_v13  ;;  %470 = vperm.xlu1 %736, %v440_v38  }
  0x29   :  { %343 = vmatpush1.bf16.msra.mxu0 %v757_v15  ;;  %465 = vperm.xlu0 %735, %v439_v37  }
  0x2a   :  { %344 = vmatprep.subr.bf16.mxu0 %v758_v16  ;;  %460 = vperm.xlu1 %736, %v438_v42  }
  0x2d   :  { %345 = vmatpush1.bf16.msra.mxu0 %v760_v18  ;;  %455 = vperm.xlu0 %735, %v437_v41  }
  0x2e   :  { %346 = vmatprep.subr.bf16.mxu0 %v761_v20  ;;  %450 = vperm.xlu1 %736, %v436_v46  }
  0x31   :  { %347 = vmatpush2.bf16.msra.mxu0 %v763_v23  ;;  %445 = vperm.xlu0 %735, %v435_v45  }
  0x32   :  { %348 = vmatprep.subr.bf16.mxu0 %v764_v24 }
  0x35   :  { %349 = vmatpush2.bf16.msra.mxu0 %v766_v27  ;;  %617 = vperm.xlu0 %735, %v614_v49  }
  0x36   :  { %350 = vmatprep.subr.bf16.mxu0 %v767_v28 }
  0x39   :  { %351 = vmatpush2.bf16.msra.mxu0 %v769_v31 }
  0x3a   :  { %352 = vmatprep.subr.bf16.mxu0 %v770_v32 }
  0x3d   :  { %353 = vmatpush2.bf16.msra.mxu0 %v772_v35 }
  0x3e   :  { %354 = vmatprep.subr.bf16.mxu0 %v773_v36 }
  0x41   :  { %355 = vmatpush2.bf16.msra.mxu0 %v775_v39 }
  0x42   :  { %356 = vmatprep.subr.bf16.mxu0 %v776_v40 }
  0x45   :  { %357 = vmatpush2.bf16.msra.mxu0 %v778_v43 }
  0x46   :  { %358 = vmatprep.subr.bf16.mxu0 %v779_v44 }
  0x49   :  { %359 = vmatpush2.bf16.msra.mxu0 %v781_v47 }
  0x4a   :  { %360 = vmatprep.subr.bf16.mxu0 %v782_v48 }
  0x4d   :  { %361 = vmatpush2.bf16.msra.mxu0 %v784_v50 }
  0x50   :  { %363 = vmatmul.mubr.bf16.vlgmr.msra.gmra.mxu0 %v785_v51 }
  0x51   :  { %372 = vmatprep.mubr.bf16.mxu0 %v788_v52 }
  0x58   :  { %373 = vmatmul.mubr.bf16.gmra.mxu0 %v790_v53 }
  0x59   :  { %382 = vmatprep.mubr.bf16.mxu0 %v791_v54 }
  0x60   :  { %383 = vmatmul.mubr.bf16.gmra.mxu0 %v793_v55 }
  0x61   :  { %392 = vmatprep.mubr.bf16.mxu0 %v794_v56 }
  0x68   :  { %393 = vmatmul.mubr.bf16.gmra.mxu0 %v796_v57 }
  0x8c   :  { %v113_v4 = vpop.permute.xlu1 %112 }
  0x90   :  { %v123_v6 = vpop.permute.xlu0 %122 }
  0x91   :  { %v118_v9 = vpop.permute.xlu1 %117 }
  0x94   :  { %v128_v11 = vpop.permute.xlu0 %127 }
  0x95   :  { %v108_v17 = vpop.permute.xlu1 %107 }
  0x98   :  { %v103_v22 = vpop.permute.xlu0 %102 }
  0x99   :  { %v98_v34 = vpop.permute.xlu1 %97 }
  0x9c   :  { %v93_v41 = vpop.permute.xlu0 %92 }
 0x110   :  { %v364_v58 = vpop.f32.mrf.mxu0 }
 0x111   :  { %v365_v51 = vadd.f32 %v364_v58, %v93_v41  ;;  %v798_v58 = vld [vmem:[%s1001_s3 + $0x8] sm:$0xff]  }
 0x112   :  { %v366_v59 = vpop.f32.mrf.mxu0 }
 0x113   :  { %v367_v44 = vadd.f32 %v366_v59, %v93_v41  ;;  %v403_v57 = vmax.f32 %v365_v51, 0.0  ;;  %v797_v59 = vld [vmem:[%s1001_s3] sm:$0xff]  }
 0x114   :  { %v368_v60 = vpop.f32.mrf.mxu0 }
 0x115   :  { %v369_v46 = vadd.f32 %v368_v60, %v98_v34  ;;  %v404_v53 = vmax.f32 %v367_v44, 0.0  ;;  %v799_v60 = vld [vmem:[%s1001_s3 + $0x10] sm:$0xff]  }
 0x116   :  { %v370_v61 = vpop.f32.mrf.mxu0 }
 0x117   :  { %v371_v38 = vadd.f32 %v370_v61, %v98_v34  ;;  %v405_v54 = vmax.f32 %v369_v46, 0.0 }
 0x118   :  { %v374_v62 = vpop.f32.mrf.mxu0 }
 0x119   :  { %v375_v42 = vadd.f32 %v374_v62, %v103_v22  ;;  %v406_v49 = vmax.f32 %v371_v38, 0.0  ;;  %v427_v61 = vpack.c.bf16 %v405_v54, %v403_v57  ;;  %v800_v62 = vld [vmem:[%s1001_s3 + $0x18] sm:$0xff]  }
 0x11a   :  { %v376_v63 = vpop.f32.mrf.mxu0 }
 0x11b   :  { %v377_v31 = vadd.f32 %v376_v63, %v103_v22  ;;  %v407_v52 = vmax.f32 %v375_v42, 0.0  ;;  %v428_v56 = vpack.c.bf16 %v406_v49, %v404_v53 }
 0x11c   :  { %v378_v1 = vpop.f32.mrf.mxu0 }
 0x11d   :  { %v379_v35 = vadd.f32 %v378_v1, %v108_v17  ;;  %v408_v45 = vmax.f32 %v377_v31, 0.0 }
 0x11e   :  { %v380_v2 = vpop.f32.mrf.mxu0 }
 0x11f   :  { %v381_v25 = vadd.f32 %v380_v2, %v108_v17  ;;  %v409_v47 = vmax.f32 %v379_v35, 0.0 }
 0x120   :  { %v384_v3 = vpop.f32.mrf.mxu0 }
 0x121   :  { %v385_v29 = vadd.f32 %v384_v3, %v113_v4  ;;  %v410_v39 = vmax.f32 %v381_v25, 0.0  ;;  %v429_v55 = vpack.c.bf16 %v409_v47, %v407_v52 }
 0x122   :  { %v386_v5 = vpop.f32.mrf.mxu0 }
 0x123   :  { %v387_v20 = vadd.f32 %v386_v5, %v113_v4  ;;  %v411_v43 = vmax.f32 %v385_v29, 0.0  ;;  %v430_v50 = vpack.c.bf16 %v410_v39, %v408_v45 }
 0x124   :  { %v388_v7 = vpop.f32.mrf.mxu0 }
 0x125   :  { %v389_v23 = vadd.f32 %v388_v7, %v118_v9  ;;  %v412_v32 = vmax.f32 %v387_v20, 0.0 }
 0x126   :  { %v390_v8 = vpop.f32.mrf.mxu0 }
 0x127   :  { %v391_v14 = vadd.f32 %v390_v8, %v118_v9  ;;  %v413_v36 = vmax.f32 %v389_v23, 0.0  ;;  %v481_v9 = vpop.permute.xlu1 %480 }
 0x128   :  { %v394_v10 = vpop.f32.mrf.mxu0 }
 0x129   :  { %v395_v18 = vadd.f32 %v394_v10, %v123_v6  ;;  %v414_v26 = vmax.f32 %v391_v14, 0.0  ;;  %v431_v48 = vpack.c.bf16 %v413_v36, %v411_v43 }
 0x12a   :  { %v396_v12 = vpop.f32.mrf.mxu0 }
 0x12b   :  { %v397_v15 = vadd.f32 %v396_v12, %v123_v6  ;;  %v415_v30 = vmax.f32 %v395_v18, 0.0  ;;  %v432_v40 = vpack.c.bf16 %v414_v26, %v412_v32  ;;  %v471_v14 = vpop.permute.xlu1 %470 }
 0x12c   :  { %v398_v13 = vpop.f32.mrf.mxu0 }
 0x12d   :  { %v399_v16 = vadd.f32 %v398_v13, %v128_v11  ;;  %v416_v27 = vmax.f32 %v397_v15, 0.0 }
 0x12e   :  { %v400_v19 = vpop.f32.mrf.mxu0 }
 0x12f   :  { %v401_v21 = vadd.f32 %v400_v19, %v128_v11  ;;  %v417_v24 = vmax.f32 %v399_v16, 0.0  ;;  %v476_v11 = vpop.permute.xlu0 %475 }
 0x131   :  { %v418_v28 = vmax.f32 %v401_v21, 0.0  ;;  %v433_v37 = vpack.c.bf16 %v417_v24, %v415_v30  ;;  %v461_v21 = vpop.permute.xlu1 %460 }
 0x133   :  { %v434_v33 = vpack.c.bf16 %v418_v28, %v416_v27  ;;  %v466_v16 = vpop.permute.xlu0 %465 }
 0x135   :  { %524 = vmatprep.subr.bf16.mxu1 %v434_v33  ;;  %v451_v38 = vpop.permute.xlu1 %450 }
 0x136   :  { %525 = vmatpush1.bf16.msra.mxu1 %v433_v37 }
 0x137   :  { %526 = vmatprep.subr.bf16.mxu1 %v432_v40  ;;  %v456_v26 = vpop.permute.xlu0 %455 }
 0x13a   :  { %527 = vmatpush1.bf16.msra.mxu1 %v431_v48 }
 0x13b   :  { %528 = vmatprep.subr.bf16.mxu1 %v430_v50  ;;  %v446_v45 = vpop.permute.xlu0 %445 }
 0x13e   :  { %529 = vmatpush1.bf16.msra.mxu1 %v429_v55 }
 0x13f   :  { %530 = vmatprep.subr.bf16.mxu1 %v428_v56 }
 0x142   :  { %531 = vmatpush1.bf16.msra.mxu1 %v427_v61 }
 0x145   :  { %725 = vmatmul.mubr.msk.bf16.vlgmr.msra.gmra.mxu1 %vm503_vm0, %v797_v59 }
 0x146   :  { %558 = vmatprep.mubr.bf16.mxu1 %v848_v0 }
 0x14d   :  { %726 = vmatmul.mubr.msk.bf16.gmra.mxu1 %vm503_vm0, %v798_v58 }
 0x14e   :  { %568 = vmatprep.mubr.bf16.mxu1 %v848_v0 }
 0x155   :  { %727 = vmatmul.mubr.msk.bf16.gmra.mxu1 %vm503_vm0, %v799_v60 }
 0x156   :  { %578 = vmatprep.mubr.bf16.mxu1 %v848_v0 }
 0x15d   :  { %728 = vmatmul.mubr.msk.bf16.gmra.mxu1 %vm503_vm0, %v800_v62 }
 0x15e   :  { %655 = vmatprep.mubr.bf16.mxu1 %v848_v0 }
 0x205   :  { %v550_v63 = vpop.f32.mrf.mxu1 }
 0x206   :  { %v551_v55 = vadd.f32 %v550_v63, %v446_v45 }
 0x207   :  { %v552_v1 = vpop.f32.mrf.mxu1 }
 0x208   :  { %v553_v48 = vadd.f32 %v552_v1, %v446_v45  ;;  %v589_v60 = vmax.f32 %v551_v55, 0.0  ;;  %v605_v1 = vld [vmem:[%s1003_s5] sm:$0xf] }
 0x209   :  { %v554_v2 = vpop.f32.mrf.mxu1 }
 0x20a   :  { %v555_v50 = vadd.f32 %v554_v2, %v451_v38  ;;  %v590_v57 = vmax.f32 %v553_v48, 0.0  ;;  %v618_v2 = vpop.permute.xlu0 %617 }
 0x20b   :  { %v556_v3 = vpop.f32.mrf.mxu1 }
 0x20c   :  { %v557_v42 = vadd.f32 %v556_v3, %v451_v38  ;;  %v591_v61 = vmax.f32 %v555_v50, 0.0 }
 0x20d   :  { %v560_v4 = vpop.f32.mrf.mxu1 }
 0x20e   :  { %v561_v46 = vadd.f32 %v560_v4, %v456_v26  ;;  %v592_v53 = vmax.f32 %v557_v42, 0.0  ;;  %v606_v62 = vpack.c.bf16 %v591_v61, %v589_v60 }
 0x20f   :  { %v562_v5 = vpop.f32.mrf.mxu1 }
 0x210   :  { %v563_v35 = vadd.f32 %v562_v5, %v456_v26  ;;  %v593_v56 = vmax.f32 %v561_v46, 0.0  ;;  %v607_v58 = vpack.c.bf16 %v592_v53, %v590_v57 }
 0x211   :  { %v564_v6 = vpop.f32.mrf.mxu1 }
 0x212   :  { %v565_v39 = vadd.f32 %v564_v6, %v461_v21  ;;  %v594_v49 = vmax.f32 %v563_v35, 0.0 }
 0x213   :  { %v566_v7 = vpop.f32.mrf.mxu1 }
 0x214   :  { %v567_v29 = vadd.f32 %v566_v7, %v461_v21  ;;  %v595_v51 = vmax.f32 %v565_v39, 0.0 }
 0x215   :  { %v570_v8 = vpop.f32.mrf.mxu1 }
 0x216   :  { %v571_v33 = vadd.f32 %v570_v8, %v466_v16  ;;  %v596_v43 = vmax.f32 %v567_v29, 0.0  ;;  %v608_v59 = vpack.c.bf16 %v595_v51, %v593_v56 }
 0x217   :  { %v572_v10 = vpop.f32.mrf.mxu1 }
 0x218   :  { %v573_v24 = vadd.f32 %v572_v10, %v466_v16  ;;  %v597_v47 = vmax.f32 %v571_v33, 0.0  ;;  %v609_v54 = vpack.c.bf16 %v596_v43, %v594_v49 }
 0x219   :  { %v574_v12 = vpop.f32.mrf.mxu1 }
 0x21a   :  { %v575_v27 = vadd.f32 %v574_v12, %v471_v14  ;;  %v598_v36 = vmax.f32 %v573_v24, 0.0 }
 0x21b   :  { %v576_v13 = vpop.f32.mrf.mxu1 }
 0x21c   :  { %v577_v0 = vadd.f32 %v576_v13, %v471_v14  ;;  %v599_v40 = vmax.f32 %v575_v27, 0.0 }
 0x21d   :  { %v580_v15 = vpop.f32.mrf.mxu1 }
 0x21e   :  { %v581_v22 = vadd.f32 %v580_v15, %v476_v11  ;;  %v600_v30 = vmax.f32 %v577_v0, 0.0  ;;  %v610_v52 = vpack.c.bf16 %v599_v40, %v597_v47 }
 0x21f   :  { %v582_v17 = vpop.f32.mrf.mxu1 }
 0x220   :  { %v583_v19 = vadd.f32 %v582_v17, %v476_v11  ;;  %v601_v34 = vmax.f32 %v581_v22, 0.0  ;;  %v611_v44 = vpack.c.bf16 %v600_v30, %v598_v36 }
 0x221   :  { %v584_v18 = vpop.f32.mrf.mxu1 }
 0x222   :  { %v585_v20 = vadd.f32 %v584_v18, %v481_v9  ;;  %v602_v31 = vmax.f32 %v583_v19, 0.0 }
 0x223   :  { %v586_v23 = vpop.f32.mrf.mxu1 }
 0x224   :  { %v587_v25 = vadd.f32 %v586_v23, %v481_v9  ;;  %v603_v28 = vmax.f32 %v585_v20, 0.0 }
 0x226   :  { %v604_v32 = vmax.f32 %v587_v25, 0.0  ;;  %v612_v41 = vpack.c.bf16 %v603_v28, %v601_v34 }
 0x228   :  { %v613_v37 = vpack.c.bf16 %v604_v32, %v602_v31 }
 0x22a   :  { %631 = vmatprep.subr.bf16.mxu1 %v613_v37 }
 0x22b   :  { %632 = vmatpush1.bf16.msra.mxu1 %v612_v41 }
 0x22c   :  { %633 = vmatprep.subr.bf16.mxu1 %v611_v44 }
 0x22f   :  { %634 = vmatpush1.bf16.msra.mxu1 %v610_v52 }
 0x230   :  { %635 = vmatprep.subr.bf16.mxu1 %v609_v54 }
 0x233   :  { %636 = vmatpush1.bf16.msra.mxu1 %v608_v59 }
 0x234   :  { %637 = vmatprep.subr.bf16.mxu1 %v607_v58 }
 0x237   :  { %638 = vmatpush1.bf16.msra.mxu1 %v606_v62 }
 0x23a   :  { %729 = vmatmul.mubr.msk.bf16.vlgmr.msra.gmra.mxu1 %vm503_vm0, %v605_v1 }
 0x2fa   :  { %v657_v63 = vpop.f32.mrf.mxu1 }
 0x2fb   :  { %v658_v3 = vadd.f32 %v657_v63, %v618_v2 }
 0x2fc   :  { %v659_v4 = vpop.f32.mrf.mxu1 }
 0x2fd   :  { %664 = vst [vmem:[#allocation5] sm:$0xff] %v658_v3  ;;  %v660_v5 = vadd.f32 %v659_v4, %v618_v2 }
 0x2fe   :  { %v661_v6 = vpop.f32.mrf.mxu1 }
 0x2ff   :  { %665 = vst [vmem:[#allocation5 + $0x8] sm:$0xff] %v660_v5 }
 0x300   :  { %v662_v7 = vpop.f32.mrf.mxu1 }
 0x301   :  { %832 = shalt.err (!%p829_p9)
}
 0x302   :  { %675 = dma.vmem_to_hbm [thread:$0]  %s673_s14, 256, %s1005_s7, [#allocation4]  }
 0x303   :  { %843 = dma.done.wait [#allocation4], 256  }
 0x304   :  { %844 = vsyncadd [#allocation4], 4294967040 }
 0x305   :  { %679 = vsyncpa [#allocation3], 1 }
 0x306   :  { %680 = vsyncpa [#allocation4], 1 }

</bundles_post_ra>
